<compile_context>
chip_gen: v7x
topology: tpu7x:2x2x1
jax: 0.10.0
libtpu: 0.0.40
codegen_flags: <defaults>
</compile_context>

<pallas_src>
import functools
from dataclasses import dataclass

import jax
import jax.numpy as jnp
import numpy as np
from jax.experimental import pallas as pl
from jax.experimental.pallas import tpu as pltpu


@dataclass
class SegLossConf:
    use_ce_loss: bool = True
    ce_loss_alpha: float = 1.0
    use_dice_loss: bool = True
    dice_loss_alpha: float = 1.0
    use_smooth_label_loss: bool = False
    mixup_alpha: float = 0.0


def _seg_loss_kernel(logits_ref, gt_ref, ce_ref, dice_ref,
                     inter_ref, union_ref, *, smooth):
    t = pl.program_id(1)                                   # spatial-tile index

    @pl.when(t == 0)
    def _init():
        ce_ref[...] = jnp.zeros_like(ce_ref)
        dice_ref[...] = jnp.zeros_like(dice_ref)
        inter_ref[...] = jnp.zeros_like(inter_ref)
        union_ref[...] = jnp.zeros_like(union_ref)

    x = logits_ref[0].astype(jnp.float32)                  # (C, T) logits (cast on-chip)
    g = gt_ref[0].astype(jnp.int32)                        # (1, T) class ids

    # --- softmax / log-sum-exp along the class (sublane) axis ---
    m = jnp.max(x, axis=0, keepdims=True)                  # (1, T)
    ex = jnp.exp(x - m)                                    # (C, T)
    denom = jnp.sum(ex, axis=0, keepdims=True)             # (1, T)
    inv = pl.reciprocal(denom, approx=True)                # EUP, not C*T divides
    p = ex * inv                                           # softmax probs (C, T)
    logz = jnp.log(denom) + m                              # log-sum-exp (1, T)

    # --- one-hot of gt as a boolean class-match mask (== SegLoss._onehot) ---
    cls_ids = jax.lax.broadcasted_iota(jnp.int32, x.shape, 0)   # (C, T)
    mask = cls_ids == g                                         # (C, T) bool

    # --- cross-entropy partial sum (F.cross_entropy, reduction='mean') ---
    x_gt = jnp.sum(jnp.where(mask, x, 0.0), axis=0, keepdims=True)   # (1, T)
    ce_ref[...] += jnp.sum(logz - x_gt)

    # --- per-class dice accumulators across spatial tiles ---
    inter_ref[...] += jnp.sum(jnp.where(mask, p, 0.0), axis=1, keepdims=True)   # (C,1)
    union_ref[...] += (jnp.sum(p, axis=1, keepdims=True)
                       + jnp.sum(mask.astype(jnp.float32), axis=1, keepdims=True))

    @pl.when(t == pl.num_programs(1) - 1)
    def _finalize():
        inter = inter_ref[...]
        union = union_ref[...]
        dice_b = jnp.sum(1.0 - (2.0 * inter + smooth) / (union + smooth))
        dice_ref[...] = dice_b + jnp.zeros_like(dice_ref)


def _pick_tile_hw(hw, target=2048):
    """Largest multiple of 128 that divides hw, capped at `target` lanes."""
    if hw % 128 != 0:
        return hw                      # fall back to the whole row
    t = min(hw, target)
    t -= t % 128
    if t == 0:
        return hw
    while hw % t != 0:
        t -= 128
    return t


def seg_loss_pallas(logits_nchw, gt_hw, conf: SegLossConf, tile_hw=None):
    """Pallas equivalent of SegLoss.forward for num_classes > 2, no mixup,
    no label smoothing."""
    B, C, H, W = logits_nchw.shape
    HW = H * W

    # Keep native dtypes (no extra HBM pass): reshape only.
    logits = logits_nchw.reshape(B, C, HW)
    gt = gt_hw.reshape(B, 1, HW)

    if tile_hw is None:
        tile_hw = _pick_tile_hw(HW)
    assert HW % tile_hw == 0, "tile_hw must divide H*W"
    n_tiles = HW // tile_hw

    kernel = functools.partial(_seg_loss_kernel, smooth=1e-7)

    # Explicit scoped-VMEM budget: double-buffered logits + gt tiles + headroom,
    # capped at 48 MiB so it is safe on v7x (64 MiB physical) as well.
    c_pad = ((C + 7) // 8) * 8
    lbytes = jnp.dtype(logits.dtype).itemsize
    gbytes = jnp.dtype(gt.dtype).itemsize
    per_buf = c_pad * tile_hw * lbytes + 8 * tile_hw * gbytes
    vmem_limit = int(min(max(4 * per_buf + (4 << 20), 32 << 20), 48 << 20))

    ce_part, dice_part = pl.pallas_call(
        kernel,
        out_shape=(jax.ShapeDtypeStruct((B, 1, 1), jnp.float32),
                   jax.ShapeDtypeStruct((B, 1, 1), jnp.float32)),
        grid_spec=pltpu.PrefetchScalarGridSpec(
            num_scalar_prefetch=0,
            grid=(B, n_tiles),
            in_specs=[
                pl.BlockSpec((1, C, tile_hw), lambda b, t: (b, 0, t)),
                pl.BlockSpec((1, 1, tile_hw), lambda b, t: (b, 0, t)),
            ],
            out_specs=(
                pl.BlockSpec((1, 1, 1), lambda b, t: (b, 0, 0)),
                pl.BlockSpec((1, 1, 1), lambda b, t: (b, 0, 0)),
            ),
            scratch_shapes=[
                pltpu.VMEM((C, 1), jnp.float32),   # dice intersection per class
                pltpu.VMEM((C, 1), jnp.float32),   # dice union per class
            ],
        ),
        compiler_params=pltpu.CompilerParams(
            dimension_semantics=("parallel", "arbitrary"),  # batch || , HW reduce
            vmem_limit_bytes=vmem_limit),
    )(logits, gt)

    losses = {}
    if conf.use_ce_loss:
        # TODO(synk): label-smoothing CE and binary (num_classes<=2) BCE
        # branches not implemented; this covers the standard multi-class path.
        losses['C'] = (jnp.sum(ce_part) / jnp.float32(B * HW)) * conf.ce_loss_alpha
    if conf.use_dice_loss:
        # TODO(synk): mixup path (category_dice_loss_mixup) references an
        # undefined `cfg` in the original module and needs tuple targets — skipped.
        losses['D'] = (jnp.sum(dice_part) / jnp.float32(C * B)) * conf.dice_loss_alpha
    return losses


def _ref_losses(logits, gt, conf: SegLossConf):
    """Pure-JAX reference mirroring the PyTorch module semantics."""
    B, C, H, W = logits.shape
    lf = logits.astype(jnp.float32)
    logp = jax.nn.log_softmax(lf, axis=1)
    ce = -jnp.take_along_axis(logp, gt[:, None].astype(jnp.int32), axis=1).mean()
    p = jax.nn.softmax(lf, axis=1)
    onehot = jax.nn.one_hot(gt, C, axis=1, dtype=jnp.float32)
    inter = jnp.einsum('bcxy,bcxy->bc', p, onehot)
    union = jnp.einsum('bcxy->bc', p) + jnp.einsum('bcxy->bc', onehot)
    smooth = 1e-7
    dice = jnp.sum(1.0 - (2.0 * inter + smooth) / (union + smooth)) / C / B
    return {'C': ce * conf.ce_loss_alpha, 'D': dice * conf.dice_loss_alpha}


if __name__ == "__main__":
    B, C, H, W = 2, 4, 16, 16
    key = jax.random.PRNGKey(0)
    k1, k2 = jax.random.split(key)
    # Native training dtypes: bf16 logits, int32 class ids (no wrapper casts).
    logits = jax.random.normal(k1, (B, C, H, W), dtype=jnp.float32).astype(jnp.bfloat16)
    gt = jax.random.randint(k2, (B, H, W), 0, C, dtype=jnp.int32)

    conf = SegLossConf()
    # tile_hw=128 forces 2 spatial tiles per sample to exercise the
    # cross-tile dice/CE accumulation path.
    out = seg_loss_pallas(logits, gt, conf, tile_hw=128)
    out = jax.tree_util.tree_map(jax.block_until_ready, out)

    ref = _ref_losses(logits, gt, conf)
    assert np.allclose(np.asarray(out['C']), np.asarray(ref['C']),
                       rtol=1e-4, atol=1e-4), (out['C'], ref['C'])
    # Dice uses the approximate EUP reciprocal for the softmax -> looser tol.
    assert np.allclose(np.asarray(out['D']), np.asarray(ref['D']),
                       rtol=2e-3, atol=2e-3), (out['D'], ref['D'])
    print("KERNEL_OK")
</pallas_src>

<mosaic_0001>
module attributes {stable_mosaic.version = 11 : i64} {
  func.func @_seg_loss_kernel(%arg0: i32, %arg1: i32, %arg2: memref<1x4x128xbf16, #tpu.memory_space<vmem>>, %arg3: memref<1x1x128xi32, #tpu.memory_space<vmem>>, %arg4: memref<1x1x1xf32, #tpu.memory_space<vmem>>, %arg5: memref<1x1x1xf32, #tpu.memory_space<vmem>>, %arg6: memref<4x1xf32, #tpu.memory_space<vmem>>, %arg7: memref<4x1xf32, #tpu.memory_space<vmem>>) attributes {dimension_semantics = [#tpu.dimension_semantics<parallel>, #tpu.dimension_semantics<arbitrary>], iteration_bounds = array<i64: 2, 2>, scalar_prefetch = 0 : i64, scratch_operands = 2 : i64, tpu.core_type = #tpu.core_type<tc>, window_params = [{transform_indices = @transform_0, window_bounds = array<i64: 1, 4, 128>}, {transform_indices = @transform_1, window_bounds = array<i64: 1, 1, 128>}, {transform_indices = @transform_2, window_bounds = array<i64: 1, 1, 1>}, {transform_indices = @transform_3, window_bounds = array<i64: 1, 1, 1>}]} {
    %c0_i32 = arith.constant 0 : i32
    %0 = arith.cmpi eq, %arg1, %c0_i32 : i32
    %1 = arith.extui %0 : i1 to i32
    %c0_i32_0 = arith.constant 0 : i32
    %2 = arith.cmpi ne, %1, %c0_i32_0 : i32
    scf.if %2 {
      %cst_29 = arith.constant 0.000000e+00 : f32
      %56 = vector.broadcast %cst_29 : f32 to vector<1x1x1xf32>
      %c0_30 = arith.constant 0 : index
      %c0_31 = arith.constant 0 : index
      %c0_32 = arith.constant 0 : index
      %57 = vector.load %arg4[%c0_30, %c0_31, %c0_32] : memref<1x1x1xf32, #tpu.memory_space<vmem>>, vector<1x1x1xf32>
      tpu.vector_store %arg4[%c0_30, %c0_31, %c0_32], %56 {strides = array<i32>} : memref<1x1x1xf32, #tpu.memory_space<vmem>>, vector<1x1x1xf32>,
      %cst_33 = arith.constant 0.000000e+00 : f32
      %58 = vector.broadcast %cst_33 : f32 to vector<1x1x1xf32>
      %c0_34 = arith.constant 0 : index
      %c0_35 = arith.constant 0 : index
      %c0_36 = arith.constant 0 : index
      %59 = vector.load %arg5[%c0_34, %c0_35, %c0_36] : memref<1x1x1xf32, #tpu.memory_space<vmem>>, vector<1x1x1xf32>
      tpu.vector_store %arg5[%c0_34, %c0_35, %c0_36], %58 {strides = array<i32>} : memref<1x1x1xf32, #tpu.memory_space<vmem>>, vector<1x1x1xf32>,
      %cst_37 = arith.constant 0.000000e+00 : f32
      %60 = vector.broadcast %cst_37 : f32 to vector<4x1xf32>
      %c0_38 = arith.constant 0 : index
      %c0_39 = arith.constant 0 : index
      %61 = vector.load %arg6[%c0_38, %c0_39] : memref<4x1xf32, #tpu.memory_space<vmem>>, vector<4x1xf32>
      tpu.vector_store %arg6[%c0_38, %c0_39], %60 {strides = array<i32>} : memref<4x1xf32, #tpu.memory_space<vmem>>, vector<4x1xf32>,
      %cst_40 = arith.constant 0.000000e+00 : f32
      %62 = vector.broadcast %cst_40 : f32 to vector<4x1xf32>
      %c0_41 = arith.constant 0 : index
      %c0_42 = arith.constant 0 : index
      %63 = vector.load %arg7[%c0_41, %c0_42] : memref<4x1xf32, #tpu.memory_space<vmem>>, vector<4x1xf32>
      tpu.vector_store %arg7[%c0_41, %c0_42], %62 {strides = array<i32>} : memref<4x1xf32, #tpu.memory_space<vmem>>, vector<4x1xf32>,
    } else {
    }
    %c0 = arith.constant 0 : index
    %c0_1 = arith.constant 0 : index
    %c0_2 = arith.constant 0 : index
    %3 = vector.load %arg2[%c0, %c0_1, %c0_2] : memref<1x4x128xbf16, #tpu.memory_space<vmem>>, vector<1x4x128xbf16>
    %4 = vector.shape_cast %3 : vector<1x4x128xbf16> to vector<4x128xbf16>
    %5 = arith.extf %4 : vector<4x128xbf16> to vector<4x128xf32>
    %c0_3 = arith.constant 0 : index
    %c0_4 = arith.constant 0 : index
    %c0_5 = arith.constant 0 : index
    %6 = vector.load %arg3[%c0_3, %c0_4, %c0_5] : memref<1x1x128xi32, #tpu.memory_space<vmem>>, vector<1x1x128xi32>
    %7 = vector.shape_cast %6 : vector<1x1x128xi32> to vector<1x128xi32>
    %cst = arith.constant dense<0xFF800000> : vector<128xf32>
    %8 = vector.multi_reduction <maximumf>, %5, %cst [0] : vector<4x128xf32> to vector<128xf32>
    %9 = vector.shape_cast %8 : vector<128xf32> to vector<1x128xf32>
    %10 = vector.broadcast %9 : vector<1x128xf32> to vector<4x128xf32>
    %11 = arith.subf %5, %10 : vector<4x128xf32>
    %12 = math.exp %11 : vector<4x128xf32>
    %cst_6 = arith.constant dense<0.000000e+00> : vector<128xf32>
    %13 = vector.multi_reduction <add>, %12, %cst_6 [0] : vector<4x128xf32> to vector<128xf32>
    %14 = vector.shape_cast %13 : vector<128xf32> to vector<1x128xf32>
    %15 = tpu.reciprocal %14 {approx = true} : vector<1x128xf32> -> vector<1x128xf32>
    %16 = vector.broadcast %15 : vector<1x128xf32> to vector<4x128xf32>
    %17 = arith.mulf %12, %16 : vector<4x128xf32>
    %18 = math.log %14 : vector<1x128xf32>
    %19 = arith.addf %18, %9 : vector<1x128xf32>
    %20 = tpu.iota {dimensions = array<i32: 0>} : vector<4x128xi32>
    %21 = vector.broadcast %7 : vector<1x128xi32> to vector<4x128xi32>
    %22 = arith.cmpi eq, %20, %21 : vector<4x128xi32>
    %cst_7 = arith.constant 0.000000e+00 : f32
    %23 = vector.broadcast %cst_7 : f32 to vector<4x128xf32>
    %24 = arith.select %22, %5, %23 : vector<4x128xi1>, vector<4x128xf32>
    %cst_8 = arith.constant dense<0.000000e+00> : vector<128xf32>
    %25 = vector.multi_reduction <add>, %24, %cst_8 [0] : vector<4x128xf32> to vector<128xf32>
    %26 = vector.shape_cast %25 : vector<128xf32> to vector<1x128xf32>
    %c0_9 = arith.constant 0 : index
    %c0_10 = arith.constant 0 : index
    %c0_11 = arith.constant 0 : index
    %27 = vector.load %arg4[%c0_9, %c0_10, %c0_11] : memref<1x1x1xf32, #tpu.memory_space<vmem>>, vector<1x1x1xf32>
    %28 = arith.subf %19, %26 : vector<1x128xf32>
    %29 = vector.shape_cast %28 : vector<1x128xf32> to vector<1x1x128xf32>
    %cst_12 = arith.constant dense<0.000000e+00> : vector<1xf32>
    %30 = vector.multi_reduction <add>, %29, %cst_12 [1, 2] : vector<1x1x128xf32> to vector<1xf32>
    %31 = vector.shape_cast %30 : vector<1xf32> to vector<1x1x1xf32>
    %32 = vector.extract %31[0, 0, 0] : f32 from vector<1x1x1xf32>
    %33 = vector.broadcast %32 : f32 to vector<1x1x1xf32>
    %34 = arith.addf %27, %33 : vector<1x1x1xf32>
    %c0_13 = arith.constant 0 : index
    %c0_14 = arith.constant 0 : index
    %c0_15 = arith.constant 0 : index
    %35 = vector.load %arg4[%c0_13, %c0_14, %c0_15] : memref<1x1x1xf32, #tpu.memory_space<vmem>>, vector<1x1x1xf32>
    tpu.vector_store %arg4[%c0_13, %c0_14, %c0_15], %34 {strides = array<i32>} : memref<1x1x1xf32, #tpu.memory_space<vmem>>, vector<1x1x1xf32>,
    %c0_16 = arith.constant 0 : index
    %c0_17 = arith.constant 0 : index
    %36 = vector.load %arg6[%c0_16, %c0_17] : memref<4x1xf32, #tpu.memory_space<vmem>>, vector<4x1xf32>
    %cst_18 = arith.constant 0.000000e+00 : f32
    %37 = vector.broadcast %cst_18 : f32 to vector<4x128xf32>
    %38 = arith.select %22, %17, %37 : vector<4x128xi1>, vector<4x128xf32>
    %cst_19 = arith.constant dense<0.000000e+00> : vector<4xf32>
    %39 = vector.multi_reduction <add>, %38, %cst_19 [1] : vector<4x128xf32> to vector<4xf32>
    %40 = vector.shape_cast %39 : vector<4xf32> to vector<4x1xf32>
    %41 = arith.addf %36, %40 : vector<4x1xf32>
    %c0_20 = arith.constant 0 : index
    %c0_21 = arith.constant 0 : index
    %42 = vector.load %arg6[%c0_20, %c0_21] : memref<4x1xf32, #tpu.memory_space<vmem>>, vector<4x1xf32>
    tpu.vector_store %arg6[%c0_20, %c0_21], %41 {strides = array<i32>} : memref<4x1xf32, #tpu.memory_space<vmem>>, vector<4x1xf32>,
    %c0_22 = arith.constant 0 : index
    %c0_23 = arith.constant 0 : index
    %43 = vector.load %arg7[%c0_22, %c0_23] : memref<4x1xf32, #tpu.memory_space<vmem>>, vector<4x1xf32>
    %cst_24 = arith.constant dense<0.000000e+00> : vector<4xf32>
    %44 = vector.multi_reduction <add>, %17, %cst_24 [1] : vector<4x128xf32> to vector<4xf32>
    %45 = vector.shape_cast %44 : vector<4xf32> to vector<4x1xf32>
    %46 = arith.extui %22 : vector<4x128xi1> to vector<4x128xi32>
    %47 = arith.sitofp %46 : vector<4x128xi32> to vector<4x128xf32>
    %cst_25 = arith.constant dense<0.000000e+00> : vector<4xf32>
    %48 = vector.multi_reduction <add>, %47, %cst_25 [1] : vector<4x128xf32> to vector<4xf32>
    %49 = vector.shape_cast %48 : vector<4xf32> to vector<4x1xf32>
    %50 = arith.addf %45, %49 : vector<4x1xf32>
    %51 = arith.addf %43, %50 : vector<4x1xf32>
    %c0_26 = arith.constant 0 : index
    %c0_27 = arith.constant 0 : index
    %52 = vector.load %arg7[%c0_26, %c0_27] : memref<4x1xf32, #tpu.memory_space<vmem>>, vector<4x1xf32>
    tpu.vector_store %arg7[%c0_26, %c0_27], %51 {strides = array<i32>} : memref<4x1xf32, #tpu.memory_space<vmem>>, vector<4x1xf32>,
    %c1_i32 = arith.constant 1 : i32
    %53 = arith.cmpi eq, %arg1, %c1_i32 : i32
    %54 = arith.extui %53 : i1 to i32
    %c0_i32_28 = arith.constant 0 : i32
    %55 = arith.cmpi ne, %54, %c0_i32_28 : i32
    scf.if %55 {
      %c0_29 = arith.constant 0 : index
      %c0_30 = arith.constant 0 : index
      %56 = vector.load %arg6[%c0_29, %c0_30] : memref<4x1xf32, #tpu.memory_space<vmem>>, vector<4x1xf32>
      %c0_31 = arith.constant 0 : index
      %c0_32 = arith.constant 0 : index
      %57 = vector.load %arg7[%c0_31, %c0_32] : memref<4x1xf32, #tpu.memory_space<vmem>>, vector<4x1xf32>
      %cst_33 = arith.constant 2.000000e+00 : f32
      %58 = vector.broadcast %cst_33 : f32 to vector<4x1xf32>
      %59 = arith.mulf %58, %56 : vector<4x1xf32>
      %cst_34 = arith.constant 1.000000e-07 : f32
      %60 = vector.broadcast %cst_34 : f32 to vector<4x1xf32>
      %61 = arith.addf %59, %60 : vector<4x1xf32>
      %cst_35 = arith.constant 1.000000e-07 : f32
      %62 = vector.broadcast %cst_35 : f32 to vector<4x1xf32>
      %63 = arith.addf %57, %62 : vector<4x1xf32>
      %64 = arith.divf %61, %63 : vector<4x1xf32>
      %cst_36 = arith.constant 1.000000e+00 : f32
      %65 = vector.broadcast %cst_36 : f32 to vector<4x1xf32>
      %66 = arith.subf %65, %64 : vector<4x1xf32>
      %67 = vector.shape_cast %66 : vector<4x1xf32> to vector<1x4x1xf32>
      %cst_37 = arith.constant dense<0.000000e+00> : vector<1xf32>
      %68 = vector.multi_reduction <add>, %67, %cst_37 [1, 2] : vector<1x4x1xf32> to vector<1xf32>
      %69 = vector.shape_cast %68 : vector<1xf32> to vector<1x1x1xf32>
      %70 = vector.extract %69[0, 0, 0] : f32 from vector<1x1x1xf32>
      %cst_38 = arith.constant 0.000000e+00 : f32
      %71 = vector.broadcast %cst_38 : f32 to vector<1x1x1xf32>
      %72 = vector.broadcast %70 : f32 to vector<1x1x1xf32>
      %73 = arith.addf %72, %71 : vector<1x1x1xf32>
      %c0_39 = arith.constant 0 : index
      %c0_40 = arith.constant 0 : index
      %c0_41 = arith.constant 0 : index
      %74 = vector.load %arg5[%c0_39, %c0_40, %c0_41] : memref<1x1x1xf32, #tpu.memory_space<vmem>>, vector<1x1x1xf32>
      tpu.vector_store %arg5[%c0_39, %c0_40, %c0_41], %73 {strides = array<i32>} : memref<1x1x1xf32, #tpu.memory_space<vmem>>, vector<1x1x1xf32>,
    } else {
    }
    return
  }
  func.func @transform_0(%arg0: i32, %arg1: i32) -> (i32, i32, i32) {
    %c0_i32 = arith.constant 0 : i32
    %c0_i32_0 = arith.constant 0 : i32
    return %arg0, %c0_i32, %arg1 : i32, i32, i32
  }
  func.func @transform_1(%arg0: i32, %arg1: i32) -> (i32, i32, i32) {
    %c0_i32 = arith.constant 0 : i32
    %c0_i32_0 = arith.constant 0 : i32
    return %arg0, %c0_i32, %arg1 : i32, i32, i32
  }
  func.func @transform_2(%arg0: i32, %arg1: i32) -> (i32, i32, i32) {
    %c0_i32 = arith.constant 0 : i32
    %c0_i32_0 = arith.constant 0 : i32
    %c0_i32_1 = arith.constant 0 : i32
    return %arg0, %c0_i32, %c0_i32_0 : i32, i32, i32
  }
  func.func @transform_3(%arg0: i32, %arg1: i32) -> (i32, i32, i32) {
    %c0_i32 = arith.constant 0 : i32
    %c0_i32_0 = arith.constant 0 : i32
    %c0_i32_1 = arith.constant 0 : i32
    return %arg0, %c0_i32, %c0_i32_0 : i32, i32, i32
  }
}

</mosaic_0001>

<bundles_post_ra>
// kernel: tpu_custom_call.1
= control target key start
LH: loop header
LB: loop body
LE: loop exit
PB: predicated region body
PF: predicated region fallthrough
CT: control target
= control target key end

     0   :  { %9 = vsyncpa [#allocation5], 0  ;;  %s964_s0 = inlined_call_operand.hbm [shape: bf16[2,4,256], index: 0, kind: input, shape index: {}]   ;;  %s965_s1 = inlined_call_operand.hbm [shape: s32[2,1,256], index: 1, kind: input, shape index: {}]   ;;  %s966_s2 = inlined_call_operand.vmem [shape: f32[2,1,1], index: 2, kind: output, shape index: {0}]   ;;  %s967_s3 = inlined_call_operand.vmem [shape: f32[2,1,1], index: 3, kind: output, shape index: {1}]  }
   0x1   :  { %11 = vsyncpa [#allocation5 + $0x1], 0 }
   0x2   :  { %12 = vsyncpa [#allocation7], 0 }
   0x3   :  { %14 = vsyncpa [#allocation7 + $0x1], 0  ;;  %s742_s12 = smov 0   ;;  %s744_s13 = smov 0  }
   0x4   :  { %s746_s14 = smov 0   ;;  %s748_s15 = smov 0  }
   0x5   :  { %s750_s16 = smov 0   ;;  %s752_s17 = smov 0  }
   0x6   :  { %s754_s18 = smov 0   ;;  %s756_s19 = smov 0  }
   0x7 LB: > { %s479_s20 = sadd.s32 4294967295, %s716_s19   ;;  %s29_s21 = sadd.s32 1, %s708_s17  ;;  %s716_s19 = sphi %s756_s19, %s20_s19   ;;  %s712_s18 = sphi %s754_s18, %s983_s18   ;;  %s708_s17 = sphi %s752_s17, %s982_s17   ;;  %s704_s16 = sphi %s750_s16, %s981_s16   ;;  %s700_s15 = sphi %s748_s15, %s980_s15   ;;  %s696_s14 = sphi %s746_s14, %s979_s14   ;;  %s692_s13 = sphi %s744_s13, %s978_s13   ;;  %s688_s12 = sphi %s742_s12, %s977_s12  }
   0x8   : > { %p30_p0 = scmp.ge.s32.totalorder %s29_s21, 2  ;;  %s32_s22 = sadd.s32 1, %s712_s18 }
   0x9   : > { %s41_s23 = sadd.s32 1, %s696_s14  ;;  %p48_p1 = scmp.ne.s32.totalorder %s696_s14, %s692_s13 }
   0xa   : > { %s985_s21 = smov (%p30_p0, %s29_s21), 0  ;;  %s987_s22 = smov (!%p30_p0, %s32_s22), %s712_s18 }
   0xb   : > { %s37_s24 = ssub.s32 %s708_s17, %s985_s21  ;;  %p49_p2 = scmp.eq.s32.totalorder %s716_s19, 0 }
   0xc   : > { %p34_p3 = scmp.ge.s32.totalorder %s987_s22, 2  ;;  %p54_p4 = scmp.ne.s32.totalorder %s692_s13, %s688_s12 }
   0xd   : > { %p793_p5 = por %p49_p2, %p48_p1  ;;  %p55_p6 = scmp.eq.s32.totalorder %s479_s20, 0 }
   0xe   : > { %s989_s22 = smov (%p34_p3, %s987_s22), 0  ;;  %p511_p8 = scmp.lt.s32.totalorder %s716_s19, 4 }
   0xf   : > { %p799_p7 = por %p55_p6, %p54_p4  ;;  %s36_s27 = ssub.s32 %s712_s18, %s989_s22 }
  0x10   : > { %s38_s28 = sor.u32 %s37_s24, %s36_s27  ;;  %s807_s29 = sand.u32 1, %s696_s14  }
  0x11   : > { %s970_s26 = scalar_select %p799_p7, 1, 0 }
  0x12   : > { %p39_p9 = scmp.eq.s32.totalorder %s38_s28, 0  ;;  %s483_s30 = sshll.u32 %s807_s29, 1 }
  0x13   : > { %s484_s4 = sshll.u32 %s712_s18, 1  ;;  %s162_s8 = scalar_lea.vmem [#allocation4], %s483_s30 }
  0x14   : > { %s812_s5 = scalar_select %p39_p9, %s696_s14, %s41_s23  }
  0x15   : > { %s815_s6 = sadd.s32 %s708_s17, %s484_s4  ;;  %s171_s9 = sshll.u32 %s162_s8, 4  ;;  %s823_s9 = int_to_ptr.vmem [resolvable:$true] %s171_s9 }
  0x16   : > { %s485_s7 = sshll.u32 %s815_s6, 5  ;;  %p829_p10 = pnand %p511_p8, %p793_p5 }
  0x17   : > { %s821_s12 = scalar_lea.hbm %s964_s0, %s485_s7  ;;  %s159_s23 = scalar_lea.sflag [#allocation5], %s807_s29 }
  0x18   : > { %s586_s24 = scalar_lea.hbm %s821_s12, 32  ;;  %p588_p0 = pneg %p829_p10 }
  0x19   : > { %p587_p13 = scmp.ne.s32.totalorder %s821_s12, %s586_s24  ;;  %s591_s28 = scalar_lea.hbm %s964_s0, 128 }
  0x1a   : > { %p592_p3 = scmp.lt.u32.totalorder %s821_s12, %s964_s0  ;;  %p593_p4 = scmp.lt.u32.totalorder %s591_s28, %s586_s24 }
  0x1b   : > { %p589_p1 = pnand %p588_p0, %p587_p13  ;;  %p595_p6 = scmp.lt.u32.totalorder %s586_s24, %s821_s12 }
  0x1c   : > { %p594_p5 = por %p593_p4, %p592_p3 }
  0x1d   : > { %p590_p2 = pneg %p589_p1 }
  0x1e   : > { %p596_p8 = por %p595_p6, %p594_p5 }
  0x20   : > { %p597_p9 = pnand %p596_p8, %p590_p2 }
  0x22   : > { %600 = shalt.err (!%p597_p9)
}
  0x23   : > { %s601_s7 = scalar_lea.vmem %s823_s9, 32  ;;  %s718_s8 = smov [#allocation4]  }
  0x24   : > { %p602_p13 = scmp.ne.s32.totalorder %s823_s9, %s601_s7  ;;  %s606_s10 = sshll.u32 %s718_s8, 4  ;;  %s607_s10 = int_to_ptr.vmem [resolvable:$false] %s606_s10 }
  0x25   : > { %s608_s11 = scalar_lea.vmem %s607_s10, 64  ;;  %p609_p12 = scmp.lt.s32.totalorder %s823_s9, %s607_s10 }
  0x26   : > { %p604_p1 = pnand %p602_p13, %p588_p0  ;;  %p610_p3 = scmp.lt.s32.totalorder %s608_s11, %s601_s7 }
  0x28   : > { %p605_p11 = pneg %p604_p1  ;;  %p611_p4 = por %p610_p3, %p609_p12 }
  0x2a   : > { %p612_p5 = pnand %p611_p4, %p605_p11 }
  0x2c   : > { %615 = shalt.err (!%p612_p5)
}
  0x2d   : > { %507 = dma.hbm_to_vmem [thread:$0]  (!%p829_p10), %s821_s12, 32, %s823_s9, %s159_s23  }
  0x2e   : > { %p972_p2 = scmp.lt.s32.totalorder %s716_s19, 5  ;;  %p973_p6 = scmp.ge.s32.totalorder %s716_s19, 1 }
  0x2f   : > { %s487_s27 = sshll.u32 %s815_s6, 4  ;;  %s181_s4 = scalar_lea.vmem [#allocation6], %s807_s29 }
  0x30   : > { %p865_p8 = pnand %p973_p6, %p972_p2  ;;  %s873_s30 = scalar_lea.hbm %s965_s1, %s487_s27 }
  0x31   : > { %s190_s7 = sshll.u32 %s181_s4, 4  ;;  %s179_s9 = scalar_lea.sflag [#allocation7], %s807_s29  ;;  %s191_s7 = int_to_ptr.vmem [resolvable:$true] %s190_s7 }
  0x32   : > { %s974_s24 = scalar_select %p865_p8, 1, 0 }
  0x33   : > { %s616_s12 = scalar_lea.hbm %s873_s30, 16  ;;  %s621_s8 = scalar_lea.hbm %s965_s1, 64 }
  0x34   : > { %p617_p11 = scmp.ne.s32.totalorder %s873_s30, %s616_s12  ;;  %p622_p13 = scmp.lt.u32.totalorder %s873_s30, %s965_s1 }
  0x35   : > { %p623_p1 = scmp.lt.u32.totalorder %s621_s8, %s616_s12  ;;  %p625_p4 = scmp.lt.u32.totalorder %s616_s12, %s873_s30 }
  0x36   : > { %p619_p12 = pnand %p617_p11, %p588_p0 }
  0x37   : > { %p624_p3 = por %p623_p1, %p622_p13 }
  0x38   : > { %p620_p9 = pneg %p619_p12 }
  0x39   : > { %p626_p5 = por %p625_p4, %p624_p3 }
  0x3b   : > { %p627_p2 = pnand %p626_p5, %p620_p9 }
  0x3d   : > { %630 = shalt.err (!%p627_p2)
}
  0x3e   : > { %s631_s29 = scalar_lea.vmem %s191_s7, 16  ;;  %s719_s27 = smov [#allocation6]  }
  0x3f   : > { %p632_p6 = scmp.ne.s32.totalorder %s191_s7, %s631_s29  ;;  %s636_s25 = sshll.u32 %s719_s27, 4  ;;  %s637_s25 = int_to_ptr.vmem [resolvable:$false] %s636_s25 }
  0x40   : > { %s638_s28 = scalar_lea.vmem %s637_s25, 32  ;;  %p639_p7 = scmp.lt.s32.totalorder %s191_s7, %s637_s25 }
  0x41   : > { %p634_p11 = pnand %p632_p6, %p588_p0  ;;  %p640_p8 = scmp.lt.s32.totalorder %s638_s28, %s631_s29 }
  0x43   : > { %p635_p12 = pneg %p634_p11  ;;  %p641_p1 = por %p640_p8, %p639_p7 }
  0x45   : > { %p642_p13 = pnand %p641_p1, %p635_p12 }
  0x47   : > { %645 = shalt.err (!%p642_p13)
}
  0x48   : > { %510 = dma.hbm_to_vmem [thread:$0]  (!%p829_p10), %s873_s30, 16, %s191_s7, %s179_s9  }
  0x49   : > { %p975_p9 = scmp.ne.s32.totalorder %s974_s24, 0 }
  0x4a   : > { %s201_s4 = sand.u32 (!%p975_p9), 1, %s692_s13   ;;  %p976_p0 = scmp.ne.s32.totalorder (!%p975_p9), %s970_s26, 0 }
  0x4b   : > { %199 = sbr.rel (%p975_p9) target bundleno = 538 (0x21a), region = 28  ;;  %s489_s12 = sshll.u32 (!%p975_p9), %s201_s4, 1 }
  0x4c   : > { %s202_s6 = scalar_lea.sflag (!%p975_p9), [#allocation5], %s201_s4  ;;  %s205_s23 = scalar_lea.vmem (!%p975_p9), [#allocation4], %s489_s12 }
  0x52   : > { %679 = dma.done.wait (%p976_p0), %s202_s6, 32  }
  0x53   : > { %681 = vsyncadd (%p976_p0), %s202_s6, 4294967264  ;;  %s211_s8 = scalar_lea.sflag [#allocation7], %s201_s4  ;;  %s213_s10 = scalar_lea.vmem [#allocation6], %s201_s4 }
  0x54   : > { %683 = dma.done.wait (%p976_p0), %s211_s8, 16  }
  0x55   : > { %685 = vsyncadd (%p976_p0), %s211_s8, 4294967280  ;;  %p241_p7 = scmp.lt.s32.totalorder %s704_s16, 1  ;;  %p490_p10 = scmp.ne.s32.totalorder %s700_s15, 0 }
  0x56   : > { %vm251_vm0 = vcmask (!%p490_p10), 0   ;;  %vm254_vm1 = vcmask (!%p490_p10), 3072   ;;  %v720_v0 = vmov (!%p490_p10), 0.0  }
  0x57   : > { %s991_s16 = smov (!%p241_p7, %s704_s16), 1  ;;  %250 = sbr.rel (%p490_p10) target bundleno = 94 (0x5e), region = 40 }
  0x58   : > { %s912_s30 = scalar_lea.vmem %s966_s2, %s991_s16  ;;  %s917_s11 = scalar_lea.vmem %s967_s3, %s991_s16  ;;  %255 = vst.msk [vmem:[#allocation2] sm:$0xf] (!%p490_p10), %vm254_vm1, %v720_v0  ;;  %256 = vst.msk [vmem:[#allocation3] sm:$0xf] (!%p490_p10), %vm254_vm1, %v720_v0 }
  0x59   : > { %252 = vst.msk [vmem:[%s912_s30] sm:$0x1] (!%p490_p10), %vm251_vm0, %v720_v0  ;;  %253 = vst.msk [vmem:[%s917_s11] sm:$0x1] (!%p490_p10), %vm251_vm0, %v720_v0 }
  0x5e PF: > { %v257_v1 = vld [vmem:[%s205_s23] sm:$0x3]  ;;  %vm260_vm2 = vcmask 1043456   ;;  %v283_v2 = vlaneseq  ;;  %v491_v4 = vld [vmem:[%s213_s10] ss:$0 sm:$0xff]  ;;  %v721_v8 = vmov 0.0  }
  0x5f   : > { %v258_v3 = vunpack.c.l.bf16 %v257_v1  ;;  %vm300_vm4 = vcmask 1040384   ;;  %v315_v45 = vld [vmem:[#allocation2] sm:$0xf]  ;;  %vm321_vm5 = vcmask 3072   ;;  %v323_v51 = vld [vmem:[#allocation3] sm:$0xf] }
  0x60   : > { %v284_v5 = vshrl.u32 %v283_v2, 7  ;;  %v298_v59 = vld [vmem:[%s912_s30] sm:$0x1]  ;;  %vm313_vm6 = vcmask 0   ;;  %p493_p8 = scmp.ne.s32.totalorder %s700_s15, 1 }
  0x61   : > { %v261_v6 = vsel %vm260_vm2, %v258_v3, -inf }
  0x62   : > { %v262_v7 = vrot.slane %v261_v6, 4  ;;  %vm289_vm3 = vcmp.eq.s32.totalorder %v284_v5, %v491_v4 }
  0x63   : > { %v492_v9 = vsel %vm289_vm3, 1.0, %v721_v8  ;;  %v290_v18 = vsel %vm289_vm3, %v258_v3, 0.0 }
  0x64   : > { %v263_v10 = vmax.f32 %v261_v6, %v262_v7  ;;  %v329_v11 = vsel %vm260_vm2, %v492_v9, 0.0  ;;  %v291_v22 = vsel %vm260_vm2, %v290_v18, 0.0 }
  0x65   : > { %330 = vadd.xlane.f32.xlu1 %v329_v11  ;;  %v292_v24 = vrot.slane %v291_v22, 4 }
  0x66   : > { %v264_v12 = vrot.slane %v263_v10, 2 }
  0x67   : > { %v293_v27 = vadd.f32 %v292_v24, %v291_v22 }
  0x68   : > { %v265_v13 = vmax.f32 %v263_v10, %v264_v12 }
  0x69   : > { %v294_v30 = vrot.slane %v293_v27, 2 }
  0x6a   : > { %v266_v14 = vrot.slane %v265_v13, 1 }
  0x6b   : > { %v295_v31 = vadd.f32 %v294_v30, %v293_v27 }
  0x6c   : > { %v267_v15 = vmax.f32 %v265_v13, %v266_v14 }
  0x6d   : > { %v296_v32 = vrot.slane %v295_v31, 1 }
  0x6e   : > { %v268_v16 = vsub.f32 %v258_v3, %v267_v15 }
  0x6f   : > { %v297_v36 = vadd.f32 %v296_v32, %v295_v31 }
  0x70   : > { %v269_v17 = vmul.f32 1.442695, %v268_v16 }
  0x72   : > { %578 = vpow2.f32 %v269_v17 }
  0x7c   : > { %v579_v19 = vpop.eup %578 }
  0x7d   : > { %v271_v20 = vsel %vm260_vm2, %v579_v19, 0.0 }
  0x7e   : > { %v272_v21 = vrot.slane %v271_v20, 4 }
  0x80   : > { %v273_v23 = vadd.f32 %v272_v21, %v271_v20 }
  0x82   : > { %v274_v25 = vrot.slane %v273_v23, 2 }
  0x84   : > { %v275_v26 = vadd.f32 %v274_v25, %v273_v23 }
  0x86   : > { %v276_v28 = vrot.slane %v275_v26, 1 }
  0x88   : > { %v277_v29 = vadd.f32 %v276_v28, %v275_v26 }
  0x8a   : > { %580 = vlog2.f32 %v277_v29 }
  0x8b   : > { %582 = vrcp.f32 %v277_v29 }
  0x94   : > { %v581_v33 = vpop.eup %580 }
  0x95   : > { %v583_v34 = vpop.eup %582  ;;  %v281_v35 = vmul.f32 0.6931472, %v581_v33 }
  0x96   : > { %v279_v37 = vmul.f32 %v583_v34, %v579_v19 }
  0x97   : > { %v282_v38 = vadd.f32 %v281_v35, %v267_v15 }
  0x98   : > { %v316_v39 = vsel %vm289_vm3, %v279_v37, 0.0  ;;  %v324_v43 = vsel %vm260_vm2, %v279_v37, 0.0 }
  0x99   : > { %v299_v40 = vsub.f32 %v282_v38, %v297_v36  ;;  %v317_v41 = vsel %vm260_vm2, %v316_v39, 0.0 }
  0x9a   : > { %318 = vadd.xlane.f32.xlu1 %v317_v41 }
  0x9b   : > { %v301_v42 = vsel %vm300_vm4, %v299_v40, 0.0 }
  0x9c   : > { %302 = vadd.xlane.f32.xlu0 %v301_v42 }
  0xa0   : > { %325 = vadd.xlane.f32.xlu0 %v324_v43 }
  0xf2   : > { %v331_v44 = vpop.xlane.xlu1 %330 }
 0x127   : > { %v319_v46 = vpop.xlane.xlu1 %318 }
 0x128   : > { %v320_v47 = vadd.f32 %v319_v46, %v315_v45 }
 0x129   : > { %v303_v48 = vpop.xlane.xlu0 %302 }
 0x12a   : > { %v304_v49 = vrot.slane %v303_v48, 4  ;;  %322 = vst.msk [vmem:[#allocation2] sm:$0xf] %vm321_vm5, %v320_v47 }
 0x12c   : > { %v305_v50 = vadd.f32 %v304_v49, %v303_v48 }
 0x12d   : > { %v326_v52 = vpop.xlane.xlu0 %325 }
 0x12e   : > { %v306_v53 = vrot.slane %v305_v50, 2  ;;  %v332_v54 = vadd.f32 %v331_v44, %v326_v52 }
 0x130   : > { %v307_v55 = vadd.f32 %v306_v53, %v305_v50  ;;  %v333_v56 = vadd.f32 %v332_v54, %v323_v51 }
 0x131   : > { %v339_v0 = vld [vmem:[#allocation2] sm:$0xf] (!%p493_p8) }
 0x132   : > { %v308_v57 = vrot.slane %v307_v55, 1  ;;  %334 = vst.msk [vmem:[#allocation3] sm:$0xf] %vm321_vm5, %v333_v56  ;;  %v341_v1 = vmul.f32 (!%p493_p8), 2.0, %v339_v0 }
 0x134   : > { %v309_v58 = vadd.f32 %v308_v57, %v307_v55  ;;  %v342_v2 = vadd.f32 (!%p493_p8), 1e-07, %v341_v1 }
 0x136   : > { %496 = vpush %v309_v58 }
 0x139   : > { %v340_v62 = vld [vmem:[#allocation3] sm:$0xf] (!%p493_p8) }
 0x13a   : > { %v343_v63 = vadd.f32 (!%p493_p8), 1e-07, %v340_v62 }
 0x13c   : > { %584 = vrcp.f32 (!%p493_p8), %v343_v63 }
 0x146   : > { %v585_v3 = vpop.eup (!%p493_p8), %584 }
 0x147   : > { %v345_v4 = vmul.f32 (!%p493_p8), %v585_v3, %v342_v2 }
 0x149   : > { %v346_v5 = vsub.f32 (!%p493_p8), 1.0, %v345_v4 }
 0x14b   : > { %v347_v6 = vsel (!%p493_p8), %vm321_vm5, %v346_v5, 0.0 }
 0x14c   : > { %348 = vadd.xlane.f32.xlu0 (!%p493_p8), %v347_v6 }
 0x165   : > { %338 = sbr.rel (%p493_p8) target bundleno = 538 (0x21a), region = 44 }
 0x167   : > { %s497_s16 = spop %496 }
 0x168   : > { %v311_v60 = vstv %s497_s16 }
 0x169   : > { %v312_v61 = vadd.f32 %v311_v60, %v298_v59 }
 0x16b   : > { %314 = vst.msk [vmem:[%s912_s30] sm:$0x1] %vm313_vm6, %v312_v61 }
 0x1d9   : > { %v349_v7 = vpop.xlane.xlu0 %348 }
 0x1da   : > { %v350_v8 = vrot.slane %v349_v7, 4 }
 0x1dc   : > { %v351_v9 = vadd.f32 %v350_v8, %v349_v7 }
 0x1de   : > { %v352_v10 = vrot.slane %v351_v9, 2 }
 0x1e0   : > { %v353_v11 = vadd.f32 %v352_v10, %v351_v9 }
 0x1e2   : > { %v354_v12 = vrot.slane %v353_v11, 1 }
 0x1e4   : > { %v355_v13 = vadd.f32 %v354_v12, %v353_v11 }
 0x1e6   : > { %498 = vpush %v355_v13 }
 0x217   : > { %s499_s15 = spop %498 }
 0x218   : > { %v357_v14 = vstv %s499_s15 }
 0x219   : > { %359 = vst.msk [vmem:[%s917_s11] sm:$0x1] %vm313_vm6, %v357_v14 }
 0x21a PF: > { %s20_s19 = sadd.s32 1, %s716_s19   ;;  %s977_s12 = smov %s692_s13 }
 0x21b   : > { %p17_p3 = scmp.ge.s32.totalorder %s20_s19, 6   ;;  %s978_s13 = smov %s696_s14 }
 0x21c   : > { %s979_s14 = smov %s812_s5  ;;  %s980_s15 = smov %s708_s17 }
 0x21d   : > { %s981_s16 = smov %s712_s18  ;;  %s982_s17 = smov %s985_s21 }
 0x21e   : > { %s983_s18 = smov %s989_s22  ;;  %19 = sbr.rel (!%p17_p3) target bundleno = 7 (0x7), region = 101 }
 0x225   :  { %389 = vsyncpa [#allocation5], 1 }
 0x226   :  { %391 = vsyncpa [#allocation5 + $0x1], 1 }
 0x227   :  { %392 = vsyncpa [#allocation7], 1 }
 0x228   :  { %394 = vsyncpa [#allocation7 + $0x1], 1 }

</bundles_post_ra>
